<compile_context>
chip_gen: v7x
topology: tpu7x:2x2x1
jax: 0.10.0
libtpu: 0.0.40
codegen_flags: <defaults>
</compile_context>

<pallas_src>
from functools import partial

import jax
import jax.numpy as jnp
from jax.experimental import pallas as pl
from jax.experimental.pallas import tpu as pltpu


# ---- Persimmon config (scaled small, default rope) -------------------------
HIDDEN = 64
NUM_HEADS = 2
HEAD_DIM = HIDDEN // NUM_HEADS            # 32
PARTIAL_ROTARY_FACTOR = 0.5
ROPE_DIM = int(HEAD_DIM * PARTIAL_ROTARY_FACTOR)   # 16  (rotary dim)
ROPE_THETA = 25000.0                      # Persimmon default rope_theta
ATTENTION_SCALING = 1.0                   # default rope_type => 1.0

MAX_ROWS_PER_BLOCK = 2048                 # packed rows per grid step (1 MiB f32/output)


def default_rope_init(dim, base):
    # ROPE_INIT_FUNCTIONS["default"]: inv_freq = 1 / base^(arange(0, dim, 2)/dim)
    exponents = jnp.arange(0, dim, 2, dtype=jnp.float32) / float(dim)
    inv_freq = 1.0 / (base ** exponents)
    return inv_freq.astype(jnp.float32), 1.0


# ---- Pallas kernel ----------------------------------------------------------
def _rope_kernel(expand_ref, inv_ref, pos_ref, cos_ref, sin_ref, *, scaling):
    # expand_ref: (P, 128) f32  one-hot, expand[i, l] = 1 iff l // D == i
    # inv_ref:    (1, 128) f32  inv_freq tiled across the lane dimension
    # pos_ref:    (TR, P) int32 P consecutive token positions per packed row
    # cos/sin:    (TR, 128) in output dtype (lane-dense packed view of (TR*P, D))
    pos = pos_ref[...].astype(jnp.float32)                               # (TR, P)
    # Lane expansion on the MXU: pos_lane[r, l] = pos[r, l // D] (exact: 0/1 weights).
    pos_lane = jnp.dot(pos, expand_ref[...],
                       preferred_element_type=jnp.float32)               # (TR, 128)
    emb = pos_lane * inv_ref[...]                                        # VPU, f32
    cos = jnp.cos(emb)
    sin = jnp.sin(emb)
    if scaling != 1.0:          # static: skip dead multiply for default rope
        cos = cos * scaling
        sin = sin * scaling
    cos_ref[...] = cos.astype(cos_ref.dtype)
    sin_ref[...] = sin.astype(sin_ref.dtype)


def persimmon_rotary_embedding(x, position_ids, inv_freq,
                               attention_scaling=ATTENTION_SCALING,
                               max_rows_per_block=MAX_ROWS_PER_BLOCK):
    """Returns (cos, sin), each (B, S, 2*len(inv_freq)) in x.dtype."""
    B, S = position_ids.shape
    D2 = inv_freq.shape[0]
    D = 2 * D2
    out_dtype = x.dtype

    assert 128 % D == 0 and D <= 128, "rotary dim must divide 128 for packed layout"
    # TODO(synk): add a non-packed fallback path for rotary dims that don't divide 128.
    P = 128 // D                              # tokens packed per 128-lane row

    N = B * S                                 # total tokens
    R = pl.cdiv(N, P)                         # packed rows needed
    if R <= max_rows_per_block:
        TR, num_blocks = R, 1
    else:
        TR = max_rows_per_block               # multiple of 8 (and 16)
        num_blocks = pl.cdiv(R, TR)
    R_pad = TR * num_blocks

    # Positions stay int32; cast happens on the VPU inside the kernel.
    pos_flat = position_ids.reshape(-1).astype(jnp.int32)
    if R_pad * P != N:
        pos_flat = jnp.pad(pos_flat, (0, R_pad * P - N))
    pos_packed = pos_flat.reshape(R_pad, P)

    # Constant "weights": tiled inv_freq (lane layout) + one-hot lane expander.
    inv_f32 = inv_freq.astype(jnp.float32)
    inv_tiled = jnp.tile(jnp.concatenate([inv_f32, inv_f32]), P).reshape(1, 128)
    lane_group = jnp.arange(128, dtype=jnp.int32) // D                    # (128,)
    expand = (lane_group[None, :] ==
              jnp.arange(P, dtype=jnp.int32)[:, None]).astype(jnp.float32)  # (P, 128)

    kernel = partial(_rope_kernel, scaling=float(attention_scaling))

    cos_p, sin_p = pl.pallas_call(
        kernel,
        out_shape=(
            jax.ShapeDtypeStruct((R_pad, 128), out_dtype),
            jax.ShapeDtypeStruct((R_pad, 128), out_dtype),
        ),
        grid_spec=pltpu.PrefetchScalarGridSpec(
            num_scalar_prefetch=0,
            grid=(num_blocks,),
            in_specs=[
                pl.BlockSpec((P, 128), lambda i: (0, 0)),    # one-hot expander
                pl.BlockSpec((1, 128), lambda i: (0, 0)),    # tiled inv_freq
                pl.BlockSpec((TR, P), lambda i: (i, 0)),     # packed int32 positions
            ],
            out_specs=[
                pl.BlockSpec((TR, 128), lambda i: (i, 0)),
                pl.BlockSpec((TR, 128), lambda i: (i, 0)),
            ],
        ),
        compiler_params=pltpu.CompilerParams(dimension_semantics=("parallel",)),
    )(expand, inv_tiled, pos_packed)

    # Free reshape back to (B, S, D) in the common (unpadded) case.
    if R_pad * P == N:
        cos = cos_p.reshape(B, S, D)
        sin = sin_p.reshape(B, S, D)
    else:
        cos = cos_p.reshape(R_pad * P, D)[:N].reshape(B, S, D)
        sin = sin_p.reshape(R_pad * P, D)[:N].reshape(B, S, D)
    return cos, sin


# ---- Pure-JAX reference (mirrors the PyTorch forward) -----------------------
def _reference(x, position_ids, inv_freq, attention_scaling):
    pos = position_ids.astype(jnp.float32)                      # (B, S)
    freqs = pos[:, :, None] * inv_freq[None, None, :]           # (B, S, D/2)
    emb = jnp.concatenate([freqs, freqs], axis=-1)              # (B, S, D)
    cos = (jnp.cos(emb) * attention_scaling).astype(x.dtype)
    sin = (jnp.sin(emb) * attention_scaling).astype(x.dtype)
    return cos, sin


if __name__ == "__main__":
    key = jax.random.PRNGKey(0)

    B, S = 2, 8
    x = jax.random.normal(key, (B, S, HIDDEN), dtype=jnp.float32)
    # non-degenerate positions: per-batch offsets
    position_ids = (jnp.arange(S, dtype=jnp.int32)[None, :]
                    + jnp.array([[0], [5]], dtype=jnp.int32))    # (B, S)

    inv_freq, attention_scaling = default_rope_init(ROPE_DIM, ROPE_THETA)

    cos, sin = persimmon_rotary_embedding(x, position_ids, inv_freq,
                                          attention_scaling)
    jax.block_until_ready((cos, sin))

    cos_ref, sin_ref = _reference(x, position_ids, inv_freq, attention_scaling)
    assert cos.shape == (B, S, ROPE_DIM) and sin.shape == (B, S, ROPE_DIM)
    assert cos.dtype == x.dtype and sin.dtype == x.dtype
    assert jnp.allclose(cos, cos_ref, atol=1e-5, rtol=1e-5)
    assert jnp.allclose(sin, sin_ref, atol=1e-5, rtol=1e-5)

    print("KERNEL_OK")
</pallas_src>

<mosaic_0001>
module attributes {stable_mosaic.version = 11 : i64} {
  func.func @_rope_kernel(%arg0: i32, %arg1: memref<8x128xf32, #tpu.memory_space<vmem>>, %arg2: memref<1x128xf32, #tpu.memory_space<vmem>>, %arg3: memref<2x8xi32, #tpu.memory_space<vmem>>, %arg4: memref<2x128xf32, #tpu.memory_space<vmem>>, %arg5: memref<2x128xf32, #tpu.memory_space<vmem>>) attributes {dimension_semantics = [#tpu.dimension_semantics<parallel>], iteration_bounds = array<i64: 1>, scalar_prefetch = 0 : i64, scratch_operands = 0 : i64, tpu.core_type = #tpu.core_type<tc>, window_params = [{pipeline_mode = #tpu.pipeline_mode<synchronous>, transform_indices = @transform_0, window_bounds = array<i64: 8, 128>}, {pipeline_mode = #tpu.pipeline_mode<synchronous>, transform_indices = @transform_1, window_bounds = array<i64: 1, 128>}, {transform_indices = @transform_2, window_bounds = array<i64: 2, 8>}, {transform_indices = @transform_3, window_bounds = array<i64: 2, 128>}, {transform_indices = @transform_4, window_bounds = array<i64: 2, 128>}]} {
    %c0 = arith.constant 0 : index
    %c0_0 = arith.constant 0 : index
    %0 = vector.load %arg3[%c0, %c0_0] : memref<2x8xi32, #tpu.memory_space<vmem>>, vector<2x8xi32>
    %1 = arith.sitofp %0 : vector<2x8xi32> to vector<2x8xf32>
    %c0_1 = arith.constant 0 : index
    %c0_2 = arith.constant 0 : index
    %2 = vector.load %arg1[%c0_1, %c0_2] : memref<8x128xf32, #tpu.memory_space<vmem>>, vector<8x128xf32>
    %cst = arith.constant dense<0.000000e+00> : vector<2x128xf32>
    %3 = tpu.matmul %1, %2, %cst {dimension_numbers = #tpu.dot_dimension_numbers<[1], [0], [0], [1], [0, 0, 1, 1], [], []>} : vector<2x8xf32>, vector<8x128xf32>, vector<2x128xf32> -> vector<2x128xf32>
    %c0_3 = arith.constant 0 : index
    %c0_4 = arith.constant 0 : index
    %4 = vector.load %arg2[%c0_3, %c0_4] : memref<1x128xf32, #tpu.memory_space<vmem>>, vector<1x128xf32>
    %5 = vector.broadcast %4 : vector<1x128xf32> to vector<2x128xf32>
    %6 = arith.mulf %3, %5 : vector<2x128xf32>
    %7 = math.cos %6 : vector<2x128xf32>
    %8 = math.sin %6 : vector<2x128xf32>
    %c0_5 = arith.constant 0 : index
    %c0_6 = arith.constant 0 : index
    %9 = vector.load %arg4[%c0_5, %c0_6] : memref<2x128xf32, #tpu.memory_space<vmem>>, vector<2x128xf32>
    tpu.vector_store %arg4[%c0_5, %c0_6], %7 {strides = array<i32>} : memref<2x128xf32, #tpu.memory_space<vmem>>, vector<2x128xf32>,
    %c0_7 = arith.constant 0 : index
    %c0_8 = arith.constant 0 : index
    %10 = vector.load %arg5[%c0_7, %c0_8] : memref<2x128xf32, #tpu.memory_space<vmem>>, vector<2x128xf32>
    tpu.vector_store %arg5[%c0_7, %c0_8], %8 {strides = array<i32>} : memref<2x128xf32, #tpu.memory_space<vmem>>, vector<2x128xf32>,
    return
  }
  func.func @transform_0(%arg0: i32) -> (i32, i32) {
    %c0_i32 = arith.constant 0 : i32
    %c0_i32_0 = arith.constant 0 : i32
    %c0_i32_1 = arith.constant 0 : i32
    return %c0_i32, %c0_i32_0 : i32, i32
  }
  func.func @transform_1(%arg0: i32) -> (i32, i32) {
    %c0_i32 = arith.constant 0 : i32
    %c0_i32_0 = arith.constant 0 : i32
    %c0_i32_1 = arith.constant 0 : i32
    return %c0_i32, %c0_i32_0 : i32, i32
  }
  func.func @transform_2(%arg0: i32) -> (i32, i32) {
    %c0_i32 = arith.constant 0 : i32
    %c0_i32_0 = arith.constant 0 : i32
    return %arg0, %c0_i32 : i32, i32
  }
  func.func @transform_3(%arg0: i32) -> (i32, i32) {
    %c0_i32 = arith.constant 0 : i32
    %c0_i32_0 = arith.constant 0 : i32
    return %arg0, %c0_i32 : i32, i32
  }
  func.func @transform_4(%arg0: i32) -> (i32, i32) {
    %c0_i32 = arith.constant 0 : i32
    %c0_i32_0 = arith.constant 0 : i32
    return %arg0, %c0_i32 : i32, i32
  }
}

</mosaic_0001>

<bundles_post_ra>
// kernel: tpu_custom_call.1
= control target key start
LH: loop header
LB: loop body
LE: loop exit
PB: predicated region body
PF: predicated region fallthrough
CT: control target
= control target key end

     0   :  { %10 = vsyncpa [#allocation3], 0  ;;  %s560_s0 = inlined_call_operand.hbm [shape: f32[8,128], index: 0, kind: input, shape index: {}]   ;;  %s561_s1 = inlined_call_operand.vmem [shape: f32[1,128], index: 1, kind: input, shape index: {}]   ;;  %s562_s2 = inlined_call_operand.vmem [shape: s32[2,8], index: 2, kind: input, shape index: {}]   ;;  %s563_s3 = inlined_call_operand.hbm [shape: f32[2,128], index: 3, kind: output, shape index: {0}]   ;;  %s564_s4 = inlined_call_operand.hbm [shape: f32[2,128], index: 4, kind: output, shape index: {1}]  }
   0x1   :  { %11 = vsyncpa [#allocation4], 0 }
   0x2   :  { %12 = vsyncpa [#allocation7], 0  ;;  %s461_s15 = smov [#allocation2]   ;;  %s389_s19 = scalar_lea.hbm %s560_s0, 128 }
   0x3   :  { %s19_s16 = sshll.u32 %s461_s15, 4  ;;  %p390_p0 = scmp.ne.s32.totalorder %s560_s0, %s389_s19  ;;  %s20_s16 = int_to_ptr.vmem [resolvable:$true] %s19_s16 }
   0x4   :  { %p393_p1 = scmp.lt.u32.totalorder %s389_s19, %s560_s0 }
   0x6   :  { %p395_p2 = pnand %p393_p1, %p390_p0 }
   0x8   :  { %398 = shalt.err (!%p395_p2)
}
   0x9   :  { %s399_s24 = scalar_lea.vmem %s20_s16, 128  ;;  %p404_p4 = scmp.lt.s32.totalorder %s20_s16, %s20_s16 }
   0xa   :  { %p400_p3 = scmp.ne.s32.totalorder %s20_s16, %s399_s24  ;;  %p405_p5 = scmp.lt.s32.totalorder %s399_s24, %s399_s24 }
   0xc   :  { %p406_p6 = por %p405_p5, %p404_p4 }
   0xe   :  { %p407_p7 = pnand %p406_p6, %p400_p3 }
  0x10   :  { %410 = shalt.err (!%p407_p7)
}
  0x11   :  { %22 = dma.hbm_to_vmem [thread:$0]  %s560_s0, 128, %s20_s16, [#allocation3]  }
  0x12   :  { %455 = dma.done.wait [#allocation3], 128  }
  0x13   :  { %456 = vsyncadd [#allocation3], 4294967168  ;;  %v462_v0 = vmov 0.0   ;;  %vm463_vm0 = vmmov 0   ;;  %v32_v1 = vld [vmem:[#allocation2] sm:$0xff]  ;;  %vm33_vm1 = vcmask 64512  }
  0x14   :  { %365 = vmatprep.subr.mxu0 %v462_v0  ;;  %367 = vmatprep.mubr.msk.f32.mxu0 %vm463_vm0, %v462_v0  ;;  %v30_v2 = vld [vmem:[%s562_s2] sm:$0x3]  ;;  %v464_v18 = vmov 683565275   ;;  %v465_v20 = vmov 2475754826  }
  0x15   :  { %366 = vmatpush3.msra.mxu0 %v32_v1  ;;  %v31_v3 = vcvt.s32.f32 %v30_v2  ;;  %v354_v4 = vld [vmem:[%s561_s1] ss:$0 sm:$0xff]  ;;  %v466_v23 = vmov 2131351028   ;;  %v467_v26 = vmov 2102212464  }
  0x16   :  { %v468_v29 = vmov 920167782   ;;  %v469_v32 = vmov 1326507024   ;;  %s470_s0 = smov [#allocation5]   ;;  %s471_s2 = smov [#allocation6]  }
  0x17   :  { %368 = vmatmul.mubr.msk.f32.vlgmr.msra.gmra.mrb[0].mxu0 %vm33_vm1, %v31_v3  ;;  %s330_s1 = sshll.u32 %s470_s0, 4  ;;  %s340_s5 = sshll.u32 %s471_s2, 4  ;;  %s331_s1 = int_to_ptr.vmem [resolvable:$true] %s330_s1  ;;  %s341_s5 = int_to_ptr.vmem [resolvable:$true] %s340_s5 }
  0x18   :  { %s411_s6 = scalar_lea.vmem %s331_s1, 32  ;;  %p416_p9 = scmp.lt.s32.totalorder %s331_s1, %s331_s1 }
  0x19   :  { %p412_p8 = scmp.ne.s32.totalorder %s331_s1, %s411_s6  ;;  %p417_p10 = scmp.lt.s32.totalorder %s411_s6, %s411_s6 }
  0x1b   :  { %p418_p11 = por %p417_p10, %p416_p9 }
  0x1d   :  { %p419_p12 = pnand %p418_p11, %p412_p8 }
  0xea   :  { %v103_v5 = vpop.f32.mrb[0].mxu0 }
  0xeb   :  { %v515_v6 = vmul.f32 %v354_v4, %v103_v5  ;;  %v369_v7 = vpop.f32.mrb[1].mxu0 }
  0xed   :  { %v118_v8 = vand.u32 2139095040, %v515_v6  ;;  %v115_v12 = vand.u32 2147483647, %v515_v6  ;;  %vm117_vm9 = vcmp.lt.s32.totalorder %v515_v6, 0  ;;  %vm207_vm1 = vweird.f32 %v515_v6 }
  0xef   :  { %v119_v9 = vshrl.u32 %v118_v8, 23  ;;  %v122_v15 = vand.u32 8388607, %v115_v12  ;;  %vm116_vm10 = vcmp.le.f32.partialorder %v115_v12, 0.7853982 }
  0xf1   :  { %v355_v10 = vadd.s32 4294967169, %v119_v9  ;;  %v123_v34 = vor.u32 8388608, %v122_v15 }
  0xf3   :  { %v125_v11 = vadd.s32 1, %v355_v10  ;;  %v163_v48 = vshll.u32 %v123_v34, 8 }
  0xf5   :  { %vm126_vm2 = vcmp.gt.s32.totalorder %v125_v11, 0 }
  0xf6   :  { %v127_v13 = vsel %vm126_vm2, %v125_v11, 0 }
  0xf7   :  { %v129_v14 = vand.u32 31, %v127_v13  ;;  %v128_v17 = vshrl.u32 %v127_v13, 5 }
  0xf9   :  { %v130_v16 = vsub.s32 32, %v129_v14  ;;  %v132_v19 = vshll.u32 %v464_v18, %v129_v14  ;;  %v135_v21 = vshll.u32 %v465_v20, %v129_v14  ;;  %v138_v25 = vshll.u32 %v466_v23, %v129_v14 }
  0xfa   :  { %v141_v28 = vshll.u32 %v467_v26, %v129_v14  ;;  %v144_v31 = vshll.u32 %v468_v29, %v129_v14  ;;  %vm147_vm3 = vcmp.lt.s32.totalorder %v128_v17, 1  ;;  %vm150_vm4 = vcmp.lt.s32.totalorder %v128_v17, 4 }
  0xfb   :  { %v133_v22 = vshrl.u32 %v465_v20, %v130_v16  ;;  %v136_v24 = vshrl.u32 %v466_v23, %v130_v16  ;;  %v139_v27 = vshrl.u32 %v467_v26, %v130_v16  ;;  %v142_v30 = vshrl.u32 %v468_v29, %v130_v16 }
  0xfc   :  { %v145_v33 = vshrl.u32 %v469_v32, %v130_v16  ;;  %v131_v43 = vshrl.u32 %v464_v18, %v130_v16  ;;  %vm149_vm5 = vcmp.lt.s32.totalorder %v128_v17, 3  ;;  %vm148_vm6 = vcmp.lt.s32.totalorder %v128_v17, 2 }
  0xfd   :  { %v134_v35 = vor.u32 %v133_v22, %v132_v19  ;;  %v137_v36 = vor.u32 %v136_v24, %v135_v21  ;;  %v140_v37 = vor.u32 %v139_v27, %v138_v25  ;;  %v143_v38 = vor.u32 %v142_v30, %v141_v28 }
  0xfe   :  { %v146_v39 = vor.u32 %v145_v33, %v144_v31 }
  0xff   :  { %v152_v40 = vsel %vm150_vm4, %v140_v37, 2102212464  ;;  %v155_v41 = vsel %vm147_vm3, %v134_v35, %v137_v36  ;;  %v159_v42 = vsel %vm147_vm3, %v137_v36, %v140_v37  ;;  %v156_v44 = vsel %vm150_vm4, %v143_v38, 920167782 }
 0x100   :  { %v160_v45 = vsel %vm150_vm4, %v146_v39, 1326507024  ;;  %v157_v46 = vsel %vm149_vm5, %v140_v37, %v156_v44  ;;  %v151_v49 = vsel %vm147_vm3, %v131_v43, %v134_v35  ;;  %v153_v50 = vsel %vm149_vm5, %v137_v36, %v152_v40 }
 0x101   :  { %v161_v47 = vsel %vm149_vm5, %v143_v38, %v160_v45  ;;  %v158_v51 = vsel %vm148_vm6, %v155_v41, %v157_v46  ;;  %v154_v57 = vsel %vm148_vm6, %v151_v49, %v153_v50 }
 0x102   :  { %v162_v52 = vsel %vm148_vm6, %v159_v42, %v161_v47  ;;  %v524_v55 = vmul.u32.u64.low %v163_v48, %v158_v51  ;;  %v525_v56 = vmul.u32.u64.high %v163_v48, %v158_v51, %v524_v55  ;;  %v170_v59 = vmul.u32 %v163_v48, %v154_v57 }
 0x103   :  { %v521_v53 = vmul.u32.u64.low %v163_v48, %v162_v52  ;;  %v522_v54 = vmul.u32.u64.high %v163_v48, %v162_v52, %v521_v53 }
 0x104   :  { %v173_v58 = vadd.s32 1, %v525_v56 }
 0x105   :  { %vm172_vm7 = vc.u32 %v522_v54, %v524_v55  ;;  %v171_v8 = vadd.s32 %v524_v55, %v522_v54 }
 0x106   :  { %v174_v60 = vsel %vm172_vm7, %v173_v58, %v525_v56 }
 0x107   :  { %v175_v61 = vadd.s32 %v174_v60, %v170_v59 }
 0x109   :  { %v176_v62 = vadd.s32 536870912, %v175_v61 }
 0x10b   :  { %v177_v63 = vshrl.u32 %v176_v62, 30 }
 0x10d   :  { %v178_v0 = vshll.u32 %v177_v63, 30  ;;  %v201_v21 = vsub.s32 4, %v177_v63 }
 0x10f   :  { %v179_v1 = vsub.s32 %v175_v61, %v178_v0  ;;  %v202_v24 = vsel %vm117_vm9, %v201_v21, %v177_v63 }
 0x110   :  { %v204_v26 = vsel %vm116_vm10, 0, %v202_v24 }
 0x111   :  { %v181_v2 = vsub.s32 0, %v179_v1  ;;  %v311_v27 = vadd.s32 3, %v204_v26  ;;  %v208_v28 = vand.u32 3, %v204_v26 }
 0x113   :  { %v356_v3 = vmin.u32 %v181_v2, %v179_v1  ;;  %v312_v29 = vand.u32 3, %v311_v27  ;;  %vm213_vm11 = vcmp.eq.s32.totalorder %v208_v28, 2  ;;  %vm210_vm13 = vcmp.eq.s32.totalorder %v208_v28, 0 }
 0x114   :  { %vm209_vm15 = vcmp.lt.s32.totalorder %v208_v28, 2 }
 0x115   :  { %v183_v4 = vclz %v356_v3  ;;  %vm317_vm12 = vcmp.eq.s32.totalorder %v312_v29, 2  ;;  %vm314_vm14 = vcmp.eq.s32.totalorder %v312_v29, 0  ;;  %vm313_vm0 = vcmp.lt.s32.totalorder %v312_v29, 2 }
 0x117   :  { %v357_v5 = vadd.s32 4294967294, %v183_v4 }
 0x119   :  { %vm358_vm8 = vcmp.lt.s32.totalorder %v357_v5, 0 }
 0x11a   :  { %v186_v7 = vsel %vm358_vm8, 0, %v357_v5 }
 0x11b   :  { %v187_v9 = vsub.s32 32, %v186_v7  ;;  %v191_v10 = vsub.s32 4294967266, %v186_v7  ;;  %v188_v11 = vshll.u32 %v179_v1, %v186_v7 }
 0x11d   :  { %v189_v13 = vshrl.u32 %v171_v8, %v187_v9  ;;  %v192_v14 = vadd.s32 127, %v191_v10 }
 0x11f   :  { %v190_v15 = vor.u32 %v189_v13, %v188_v11  ;;  %v193_v16 = vshll.u32 %v192_v14, 23 }
 0x121   :  { %v194_v17 = vor.u32 4788187, %v193_v16  ;;  %v197_v19 = vcvt.s32.f32 %v190_v15 }
 0x123   :  { %v195_v18 = vand.u32 2147483647, %v194_v17 }
 0x125   :  { %v198_v20 = vmul.f32 %v197_v19, %v195_v18 }
 0x127   :  { %v199_v22 = vxor.u32 2147483648, %v198_v20 }
 0x129   :  { %v200_v23 = vsel %vm117_vm9, %v199_v22, %v198_v20 }
 0x12a   :  { %v203_v25 = vsel %vm116_vm10, %v515_v6, %v200_v23 }
 0x12b   :  { %385 = vcosq.f32 %v203_v25 }
 0x12c   :  { %387 = vsinq.f32 %v203_v25 }
 0x135   :  { %v386_v30 = vpop.eup %385 }
 0x136   :  { %v388_v31 = vpop.eup %387  ;;  %v214_v32 = vxor.u32 2147483648, %v386_v30 }
 0x137   :  { %v211_v33 = vxor.u32 2147483648, %v388_v31 }
 0x138   :  { %v215_v34 = vsel %vm213_vm11, %v214_v32, %v388_v31  ;;  %v319_v12 = vsel %vm317_vm12, %v214_v32, %v388_v31 }
 0x139   :  { %v212_v35 = vsel %vm210_vm13, %v386_v30, %v211_v33  ;;  %v316_v36 = vsel %vm314_vm14, %v386_v30, %v211_v33 }
 0x13a   :  { %v216_v37 = vsel %vm209_vm15, %v212_v35, %v215_v34  ;;  %v320_v38 = vsel %vm313_vm0, %v316_v36, %v319_v12 }
 0x13b   :  { %v217_v39 = vsel %vm207_vm1, nan, %v216_v37  ;;  %v321_v40 = vsel %vm207_vm1, nan, %v320_v38 }
 0x13c   :  { %322 = vst [vmem:[#allocation5] sm:$0x3] %v217_v39  ;;  %323 = vst [vmem:[#allocation6] sm:$0x3] %v321_v40 }
 0x13d   :  { %422 = shalt.err (!%p419_p12)
}
 0x13e   :  { %s423_s9 = scalar_lea.hbm %s563_s3, 32 }
 0x13f   :  { %p424_p13 = scmp.ne.s32.totalorder %s563_s3, %s423_s9  ;;  %p427_p0 = scmp.lt.u32.totalorder %s423_s9, %s563_s3 }
 0x141   :  { %p429_p1 = pnand %p427_p0, %p424_p13 }
 0x143   :  { %432 = shalt.err (!%p429_p1)
}
 0x144   :  { %333 = dma.vmem_to_hbm [thread:$0]  %s331_s1, 32, %s563_s3, [#allocation4]  }
 0x145   :  { %s433_s16 = scalar_lea.vmem %s341_s5, 32  ;;  %p438_p3 = scmp.lt.s32.totalorder %s341_s5, %s341_s5 }
 0x146   :  { %p434_p2 = scmp.ne.s32.totalorder %s341_s5, %s433_s16  ;;  %p439_p4 = scmp.lt.s32.totalorder %s433_s16, %s433_s16 }
 0x148   :  { %p440_p5 = por %p439_p4, %p438_p3 }
 0x14a   :  { %p441_p6 = pnand %p440_p5, %p434_p2 }
 0x14c   :  { %444 = shalt.err (!%p441_p6)
}
 0x14d   :  { %s445_s19 = scalar_lea.hbm %s564_s4, 32 }
 0x14e   :  { %p446_p7 = scmp.ne.s32.totalorder %s564_s4, %s445_s19  ;;  %p449_p8 = scmp.lt.u32.totalorder %s445_s19, %s564_s4 }
 0x150   :  { %p451_p9 = pnand %p449_p8, %p446_p7 }
 0x152   :  { %454 = shalt.err (!%p451_p9)
}
 0x153   :  { %343 = dma.vmem_to_hbm [thread:$0]  %s341_s5, 32, %s564_s4, [#allocation7]  }
 0x154   :  { %457 = dma.done.wait [#allocation4], 32  }
 0x155   :  { %458 = vsyncadd [#allocation4], 4294967264 }
 0x156   :  { %459 = dma.done.wait [#allocation7], 32  }
 0x157   :  { %460 = vsyncadd [#allocation7], 4294967264 }
 0x158   :  { %350 = vsyncpa [#allocation3], 1 }
 0x159   :  { %351 = vsyncpa [#allocation4], 1 }
 0x15a   :  { %352 = vsyncpa [#allocation7], 1 }

</bundles_post_ra>
